<compile_context>
chip_gen: v6e
topology: v6e:2x2x1
jax: 0.10.0
libtpu: 0.0.40
codegen_flags: <defaults>
</compile_context>

<pallas_src>
import jax
import jax.numpy as jnp
from jax.experimental import pallas as pl
from jax.experimental.pallas import tpu as pltpu

K = 3                 # CSPN kernel_size (module arg)
KK = K * K            # 9 affinity maps in the output
MID = (KK - 1) // 2   # index of the "middle" map (guide_mid)
CONV_K = 3            # the generate conv is always 3x3, stride 1, pad 1


def cspn_generate(x, conv_w, bn_gamma, bn_beta, bn_mean, bn_var, eps=1e-5):
    """x: (N, Cin, H, W) float32 NCHW, like the PyTorch module input."""
    N, Cin, H, W = x.shape
    Cout = KK - 1
    Wp = W + 2                      # padded width (= output width)
    Lout = (H + 2) * Wp             # flattened padded output plane
    Lin = (H + 5) * Wp              # 1 top + 4 bottom pad rows: every tap /
                                    # output-shift slice stays in-bounds
    x = x.astype(jnp.float32)

    # ---- fold eval-mode BatchNorm into the conv (parameter glue) ----------
    scale = bn_gamma / jnp.sqrt(bn_var + eps)                         # (Cout,)
    w_f = (conv_w * scale[:, None, None, None]).astype(jnp.float32)   # (Cout,Cin,3,3)
    b_f = (bn_beta - bn_mean * scale).astype(jnp.float32)             # (Cout,)
    # tap-major weights: w_taps[dy*3+dx, co, ci] = w_f[co, ci, dy, dx]
    w_taps = jnp.transpose(w_f, (2, 3, 0, 1)).reshape(CONV_K * CONV_K, Cout, Cin)
    b_vec = b_f.reshape(Cout, 1)

    # ---- single fused pad of the input; reshape is a free row-major view --
    x_flat = jnp.pad(x, ((0, 0), (0, 0), (1, 4), (1, 1))).reshape(N, Cin, Lin)

    # Validity mask on the flattened (H+2, W+2) grid: 1 where flat position p
    # is a real (un-shifted) output pixel, 0 on the pad rows/columns.
    mask = jnp.pad(jnp.ones((H, W), jnp.float32), ((0, 2), (0, 2))).reshape(1, Lout)

    def kernel(w_ref, b_ref, m_ref, x_ref, o_ref):
        # w_ref: (9, Cout, Cin)  BN-folded conv taps
        # b_ref: (Cout, 1)       folded BN bias
        # m_ref: (1, Lout)       validity mask of the flattened padded grid
        # x_ref: (Cin, Lin)      one batch element, padded image, row-major flat
        # o_ref: (KK, Lout)      final padded affinity maps, row-major flat
        #
        # 3x3 conv + folded BN: the tap (dy,dx) value at flat position q is
        # x_ref[:, q + dy*Wp + dx], so each tap is a lane slice of the single
        # input read; 9 accumulating MXU matmuls (no HBM im2col).
        g = jnp.zeros((Cout, Lout), jnp.float32)
        for dy in range(CONV_K):
            for dx in range(CONV_K):
                off = dy * Wp + dx
                xs = x_ref[:, off:off + Lout]                      # (Cin, Lout)
                g = g + jnp.dot(w_ref[dy * CONV_K + dx], xs,
                                preferred_element_type=jnp.float32)
        g = g + b_ref[...]                                          # (Cout, Lout)

        # Normalization: one EUP reciprocal + 2 Newton steps instead of 8
        # divides; guide_mid from the un-normalized channel sum.
        # NOTE: gsum == 0 yields Inf/NaN, matching PyTorch's divide-by-zero.
        gsum = jnp.sum(jnp.abs(g), axis=0, keepdims=True)           # (1, Lout)
        inv = pl.reciprocal(gsum, approx=True)
        inv = inv * (2.0 - gsum * inv)
        inv = inv * (2.0 - gsum * inv)
        gmid = 1.0 - jnp.sum(g, axis=0, keepdims=True) * inv        # (1, Lout)
        valid = m_ref[...] > 0.5                                    # (1, Lout)

        # ZeroPad2d placement fused in-kernel: map t goes to (top=i, left=j),
        # which on the flattened padded plane is a right-shift by i*Wp + j of
        # the masked map (the truncated tail is provably all zeros).
        o_ref[...] = jnp.zeros_like(o_ref)
        for t in range(KK):
            i, j = t // K, t % K
            off = i * Wp + j
            if t < MID:
                src = g[t:t + 1] * inv
            elif t == MID:
                src = gmid
            else:
                src = g[t - 1:t] * inv
            # select (not multiply) so garbage/NaN at pad positions -> exact 0
            src = jnp.where(valid, src, 0.0)                        # (1, Lout)
            o_ref[t:t + 1, off:Lout] = src[:, :Lout - off]

    out_flat = pl.pallas_call(
        kernel,
        out_shape=jax.ShapeDtypeStruct((N, KK, Lout), jnp.float32),
        grid=(N,),
        in_specs=[
            pl.BlockSpec((CONV_K * CONV_K, Cout, Cin), lambda b: (0, 0, 0)),
            pl.BlockSpec((Cout, 1), lambda b: (0, 0)),
            pl.BlockSpec((1, Lout), lambda b: (0, 0)),
            pl.BlockSpec((None, Cin, Lin), lambda b: (b, 0, 0)),
        ],
        out_specs=pl.BlockSpec((None, KK, Lout), lambda b: (b, 0, 0)),
        compiler_params=pltpu.CompilerParams(
            # batch elements are independent -> shard across v7x's 2 TCs
            dimension_semantics=("parallel",)),
    )(w_taps, b_vec, mask, x_flat)

    # free, row-major reshape back to the padded NCHW result
    return out_flat.reshape(N, KK, H + 2, W + 2)


def cspn_generate_reference(x, conv_w, bn_gamma, bn_beta, bn_mean, bn_var,
                            eps=1e-5):
    """Pure-JAX reference (lax conv at exact f32 precision) for validation."""
    scale = bn_gamma / jnp.sqrt(bn_var + eps)
    w_f = conv_w * scale[:, None, None, None]
    b_f = bn_beta - bn_mean * scale
    guide = jax.lax.conv_general_dilated(
        x, w_f, window_strides=(1, 1), padding=((1, 1), (1, 1)),
        dimension_numbers=("NCHW", "OIHW", "NCHW"),
        precision=jax.lax.Precision.HIGHEST)
    guide = guide + b_f[None, :, None, None]
    gsum = jnp.sum(jnp.abs(guide), axis=1, keepdims=True)
    guide = guide / gsum
    gmid = 1.0 - jnp.sum(guide, axis=1, keepdims=True)
    maps = []
    for t in range(KK):
        i, j = t // K, t % K
        if t < MID:
            src = guide[:, t:t + 1]
        elif t == MID:
            src = gmid
        else:
            src = guide[:, t - 1:t]
        maps.append(jnp.pad(src, ((0, 0), (0, 0), (i, K - 1 - i), (j, K - 1 - j))))
    return jnp.concatenate(maps, axis=1)


def make_params(key, in_channels):
    """Deterministic synthetic parameters (conv weight + BatchNorm params)."""
    cout = KK - 1
    k_w, k_g, k_b = jax.random.split(key, 3)
    fan_in = in_channels * CONV_K * CONV_K
    bound = 1.0 / (fan_in ** 0.5)
    conv_w = jax.random.uniform(k_w, (cout, in_channels, CONV_K, CONV_K),
                                jnp.float32, -bound, bound)
    bn_gamma = 1.0 + 0.1 * jax.random.normal(k_g, (cout,), jnp.float32)
    bn_beta = 0.1 * jax.random.normal(k_b, (cout,), jnp.float32)
    bn_mean = jnp.zeros((cout,), jnp.float32)
    bn_var = jnp.ones((cout,), jnp.float32)
    return conv_w, bn_gamma, bn_beta, bn_mean, bn_var


if __name__ == "__main__":
    key = jax.random.PRNGKey(0)
    k_x, k_p = jax.random.split(key)
    N, Cin, H, W = 2, 4, 16, 16
    x = jax.random.normal(k_x, (N, Cin, H, W), jnp.float32)
    params = make_params(k_p, Cin)

    out = jax.block_until_ready(cspn_generate(x, *params))
    assert out.shape == (N, KK, H + K - 1, W + K - 1), out.shape

    ref = cspn_generate_reference(x, *params)
    max_err = float(jnp.max(jnp.abs(out - ref)))
    # tolerance leaves headroom for the MXU f32-matmul rounding path
    if not bool(jnp.allclose(out, ref, atol=3e-3, rtol=3e-3)):
        raise AssertionError(f"kernel/reference mismatch, max abs err = {max_err}")
    print("KERNEL_OK")
</pallas_src>

<mosaic_0001>
module attributes {stable_mosaic.version = 11 : i64} {
  func.func @kernel(%arg0: i32, %arg1: memref<9x8x4xf32, #tpu.memory_space<vmem>>, %arg2: memref<8x1xf32, #tpu.memory_space<vmem>>, %arg3: memref<1x324xf32, #tpu.memory_space<vmem>>, %arg4: memref<1x4x378xf32, #tpu.memory_space<vmem>>, %arg5: memref<1x9x324xf32, #tpu.memory_space<vmem>>) attributes {dimension_semantics = [#tpu.dimension_semantics<parallel>], iteration_bounds = array<i64: 2>, scalar_prefetch = 0 : i64, scratch_operands = 0 : i64, tpu.core_type = #tpu.core_type<tc>, window_params = [{pipeline_mode = #tpu.pipeline_mode<synchronous>, transform_indices = @transform_0, window_bounds = array<i64: 9, 8, 4>}, {pipeline_mode = #tpu.pipeline_mode<synchronous>, transform_indices = @transform_1, window_bounds = array<i64: 8, 1>}, {pipeline_mode = #tpu.pipeline_mode<synchronous>, transform_indices = @transform_2, window_bounds = array<i64: 1, 324>}, {transform_indices = @transform_3, window_bounds = array<i64: 1, 4, 378>}, {transform_indices = @transform_4, window_bounds = array<i64: 1, 9, 324>}]} {
    %cst = arith.constant 0.000000e+00 : f32
    %0 = vector.broadcast %cst : f32 to vector<8x324xf32>
    %c0 = arith.constant 0 : index
    %c0_0 = arith.constant 0 : index
    %c0_1 = arith.constant 0 : index
    %1 = vector.load %arg4[%c0, %c0_0, %c0_1] : memref<1x4x378xf32, #tpu.memory_space<vmem>>, vector<1x4x324xf32>
    %2 = vector.shape_cast %1 : vector<1x4x324xf32> to vector<4x324xf32>
    %c0_2 = arith.constant 0 : index
    %c0_3 = arith.constant 0 : index
    %c0_4 = arith.constant 0 : index
    %3 = vector.load %arg1[%c0_2, %c0_3, %c0_4] : memref<9x8x4xf32, #tpu.memory_space<vmem>>, vector<1x8x4xf32>
    %4 = vector.shape_cast %3 : vector<1x8x4xf32> to vector<8x4xf32>
    %cst_5 = arith.constant dense<0.000000e+00> : vector<8x324xf32>
    %5 = tpu.matmul %4, %2, %cst_5 {dimension_numbers = #tpu.dot_dimension_numbers<[1], [0], [0], [1], [0, 0, 1, 1], [], []>} : vector<8x4xf32>, vector<4x324xf32>, vector<8x324xf32> -> vector<8x324xf32>
    %6 = arith.addf %0, %5 : vector<8x324xf32>
    %c0_6 = arith.constant 0 : index
    %c0_7 = arith.constant 0 : index
    %c1 = arith.constant 1 : index
    %7 = vector.load %arg4[%c0_6, %c0_7, %c1] : memref<1x4x378xf32, #tpu.memory_space<vmem>>, vector<1x4x324xf32>
    %8 = vector.shape_cast %7 : vector<1x4x324xf32> to vector<4x324xf32>
    %c1_8 = arith.constant 1 : index
    %c0_9 = arith.constant 0 : index
    %c0_10 = arith.constant 0 : index
    %9 = vector.load %arg1[%c1_8, %c0_9, %c0_10] : memref<9x8x4xf32, #tpu.memory_space<vmem>>, vector<1x8x4xf32>
    %10 = vector.shape_cast %9 : vector<1x8x4xf32> to vector<8x4xf32>
    %cst_11 = arith.constant dense<0.000000e+00> : vector<8x324xf32>
    %11 = tpu.matmul %10, %8, %cst_11 {dimension_numbers = #tpu.dot_dimension_numbers<[1], [0], [0], [1], [0, 0, 1, 1], [], []>} : vector<8x4xf32>, vector<4x324xf32>, vector<8x324xf32> -> vector<8x324xf32>
    %12 = arith.addf %6, %11 : vector<8x324xf32>
    %c0_12 = arith.constant 0 : index
    %c0_13 = arith.constant 0 : index
    %c2 = arith.constant 2 : index
    %13 = vector.load %arg4[%c0_12, %c0_13, %c2] : memref<1x4x378xf32, #tpu.memory_space<vmem>>, vector<1x4x324xf32>
    %14 = vector.shape_cast %13 : vector<1x4x324xf32> to vector<4x324xf32>
    %c2_14 = arith.constant 2 : index
    %c0_15 = arith.constant 0 : index
    %c0_16 = arith.constant 0 : index
    %15 = vector.load %arg1[%c2_14, %c0_15, %c0_16] : memref<9x8x4xf32, #tpu.memory_space<vmem>>, vector<1x8x4xf32>
    %16 = vector.shape_cast %15 : vector<1x8x4xf32> to vector<8x4xf32>
    %cst_17 = arith.constant dense<0.000000e+00> : vector<8x324xf32>
    %17 = tpu.matmul %16, %14, %cst_17 {dimension_numbers = #tpu.dot_dimension_numbers<[1], [0], [0], [1], [0, 0, 1, 1], [], []>} : vector<8x4xf32>, vector<4x324xf32>, vector<8x324xf32> -> vector<8x324xf32>
    %18 = arith.addf %12, %17 : vector<8x324xf32>
    %c0_18 = arith.constant 0 : index
    %c0_19 = arith.constant 0 : index
    %c18 = arith.constant 18 : index
    %19 = vector.load %arg4[%c0_18, %c0_19, %c18] : memref<1x4x378xf32, #tpu.memory_space<vmem>>, vector<1x4x324xf32>
    %20 = vector.shape_cast %19 : vector<1x4x324xf32> to vector<4x324xf32>
    %c3 = arith.constant 3 : index
    %c0_20 = arith.constant 0 : index
    %c0_21 = arith.constant 0 : index
    %21 = vector.load %arg1[%c3, %c0_20, %c0_21] : memref<9x8x4xf32, #tpu.memory_space<vmem>>, vector<1x8x4xf32>
    %22 = vector.shape_cast %21 : vector<1x8x4xf32> to vector<8x4xf32>
    %cst_22 = arith.constant dense<0.000000e+00> : vector<8x324xf32>
    %23 = tpu.matmul %22, %20, %cst_22 {dimension_numbers = #tpu.dot_dimension_numbers<[1], [0], [0], [1], [0, 0, 1, 1], [], []>} : vector<8x4xf32>, vector<4x324xf32>, vector<8x324xf32> -> vector<8x324xf32>
    %24 = arith.addf %18, %23 : vector<8x324xf32>
    %c0_23 = arith.constant 0 : index
    %c0_24 = arith.constant 0 : index
    %c19 = arith.constant 19 : index
    %25 = vector.load %arg4[%c0_23, %c0_24, %c19] : memref<1x4x378xf32, #tpu.memory_space<vmem>>, vector<1x4x324xf32>
    %26 = vector.shape_cast %25 : vector<1x4x324xf32> to vector<4x324xf32>
    %c4 = arith.constant 4 : index
    %c0_25 = arith.constant 0 : index
    %c0_26 = arith.constant 0 : index
    %27 = vector.load %arg1[%c4, %c0_25, %c0_26] : memref<9x8x4xf32, #tpu.memory_space<vmem>>, vector<1x8x4xf32>
    %28 = vector.shape_cast %27 : vector<1x8x4xf32> to vector<8x4xf32>
    %cst_27 = arith.constant dense<0.000000e+00> : vector<8x324xf32>
    %29 = tpu.matmul %28, %26, %cst_27 {dimension_numbers = #tpu.dot_dimension_numbers<[1], [0], [0], [1], [0, 0, 1, 1], [], []>} : vector<8x4xf32>, vector<4x324xf32>, vector<8x324xf32> -> vector<8x324xf32>
    %30 = arith.addf %24, %29 : vector<8x324xf32>
    %c0_28 = arith.constant 0 : index
    %c0_29 = arith.constant 0 : index
    %c20 = arith.constant 20 : index
    %31 = vector.load %arg4[%c0_28, %c0_29, %c20] : memref<1x4x378xf32, #tpu.memory_space<vmem>>, vector<1x4x324xf32>
    %32 = vector.shape_cast %31 : vector<1x4x324xf32> to vector<4x324xf32>
    %c5 = arith.constant 5 : index
    %c0_30 = arith.constant 0 : index
    %c0_31 = arith.constant 0 : index
    %33 = vector.load %arg1[%c5, %c0_30, %c0_31] : memref<9x8x4xf32, #tpu.memory_space<vmem>>, vector<1x8x4xf32>
    %34 = vector.shape_cast %33 : vector<1x8x4xf32> to vector<8x4xf32>
    %cst_32 = arith.constant dense<0.000000e+00> : vector<8x324xf32>
    %35 = tpu.matmul %34, %32, %cst_32 {dimension_numbers = #tpu.dot_dimension_numbers<[1], [0], [0], [1], [0, 0, 1, 1], [], []>} : vector<8x4xf32>, vector<4x324xf32>, vector<8x324xf32> -> vector<8x324xf32>
    %36 = arith.addf %30, %35 : vector<8x324xf32>
    %c0_33 = arith.constant 0 : index
    %c0_34 = arith.constant 0 : index
    %c36 = arith.constant 36 : index
    %37 = vector.load %arg4[%c0_33, %c0_34, %c36] : memref<1x4x378xf32, #tpu.memory_space<vmem>>, vector<1x4x324xf32>
    %38 = vector.shape_cast %37 : vector<1x4x324xf32> to vector<4x324xf32>
    %c6 = arith.constant 6 : index
    %c0_35 = arith.constant 0 : index
    %c0_36 = arith.constant 0 : index
    %39 = vector.load %arg1[%c6, %c0_35, %c0_36] : memref<9x8x4xf32, #tpu.memory_space<vmem>>, vector<1x8x4xf32>
    %40 = vector.shape_cast %39 : vector<1x8x4xf32> to vector<8x4xf32>
    %cst_37 = arith.constant dense<0.000000e+00> : vector<8x324xf32>
    %41 = tpu.matmul %40, %38, %cst_37 {dimension_numbers = #tpu.dot_dimension_numbers<[1], [0], [0], [1], [0, 0, 1, 1], [], []>} : vector<8x4xf32>, vector<4x324xf32>, vector<8x324xf32> -> vector<8x324xf32>
    %42 = arith.addf %36, %41 : vector<8x324xf32>
    %c0_38 = arith.constant 0 : index
    %c0_39 = arith.constant 0 : index
    %c37 = arith.constant 37 : index
    %43 = vector.load %arg4[%c0_38, %c0_39, %c37] : memref<1x4x378xf32, #tpu.memory_space<vmem>>, vector<1x4x324xf32>
    %44 = vector.shape_cast %43 : vector<1x4x324xf32> to vector<4x324xf32>
    %c7 = arith.constant 7 : index
    %c0_40 = arith.constant 0 : index
    %c0_41 = arith.constant 0 : index
    %45 = vector.load %arg1[%c7, %c0_40, %c0_41] : memref<9x8x4xf32, #tpu.memory_space<vmem>>, vector<1x8x4xf32>
    %46 = vector.shape_cast %45 : vector<1x8x4xf32> to vector<8x4xf32>
    %cst_42 = arith.constant dense<0.000000e+00> : vector<8x324xf32>
    %47 = tpu.matmul %46, %44, %cst_42 {dimension_numbers = #tpu.dot_dimension_numbers<[1], [0], [0], [1], [0, 0, 1, 1], [], []>} : vector<8x4xf32>, vector<4x324xf32>, vector<8x324xf32> -> vector<8x324xf32>
    %48 = arith.addf %42, %47 : vector<8x324xf32>
    %c0_43 = arith.constant 0 : index
    %c0_44 = arith.constant 0 : index
    %c38 = arith.constant 38 : index
    %49 = vector.load %arg4[%c0_43, %c0_44, %c38] : memref<1x4x378xf32, #tpu.memory_space<vmem>>, vector<1x4x324xf32>
    %50 = vector.shape_cast %49 : vector<1x4x324xf32> to vector<4x324xf32>
    %c8 = arith.constant 8 : index
    %c0_45 = arith.constant 0 : index
    %c0_46 = arith.constant 0 : index
    %51 = vector.load %arg1[%c8, %c0_45, %c0_46] : memref<9x8x4xf32, #tpu.memory_space<vmem>>, vector<1x8x4xf32>
    %52 = vector.shape_cast %51 : vector<1x8x4xf32> to vector<8x4xf32>
    %cst_47 = arith.constant dense<0.000000e+00> : vector<8x324xf32>
    %53 = tpu.matmul %52, %50, %cst_47 {dimension_numbers = #tpu.dot_dimension_numbers<[1], [0], [0], [1], [0, 0, 1, 1], [], []>} : vector<8x4xf32>, vector<4x324xf32>, vector<8x324xf32> -> vector<8x324xf32>
    %54 = arith.addf %48, %53 : vector<8x324xf32>
    %c0_48 = arith.constant 0 : index
    %c0_49 = arith.constant 0 : index
    %55 = vector.load %arg2[%c0_48, %c0_49] : memref<8x1xf32, #tpu.memory_space<vmem>>, vector<8x1xf32>
    %56 = vector.broadcast %55 : vector<8x1xf32> to vector<8x324xf32>
    %57 = arith.addf %54, %56 : vector<8x324xf32>
    %58 = math.absf %57 : vector<8x324xf32>
    %cst_50 = arith.constant dense<0.000000e+00> : vector<324xf32>
    %59 = vector.multi_reduction <add>, %58, %cst_50 [0] : vector<8x324xf32> to vector<324xf32>
    %60 = vector.shape_cast %59 : vector<324xf32> to vector<1x324xf32>
    %61 = tpu.reciprocal %60 {approx = true} : vector<1x324xf32> -> vector<1x324xf32>
    %62 = arith.mulf %60, %61 : vector<1x324xf32>
    %cst_51 = arith.constant 2.000000e+00 : f32
    %63 = vector.broadcast %cst_51 : f32 to vector<1x324xf32>
    %64 = arith.subf %63, %62 : vector<1x324xf32>
    %65 = arith.mulf %61, %64 : vector<1x324xf32>
    %66 = arith.mulf %60, %65 : vector<1x324xf32>
    %cst_52 = arith.constant 2.000000e+00 : f32
    %67 = vector.broadcast %cst_52 : f32 to vector<1x324xf32>
    %68 = arith.subf %67, %66 : vector<1x324xf32>
    %69 = arith.mulf %65, %68 : vector<1x324xf32>
    %cst_53 = arith.constant dense<0.000000e+00> : vector<324xf32>
    %70 = vector.multi_reduction <add>, %57, %cst_53 [0] : vector<8x324xf32> to vector<324xf32>
    %71 = vector.shape_cast %70 : vector<324xf32> to vector<1x324xf32>
    %72 = arith.mulf %71, %69 : vector<1x324xf32>
    %cst_54 = arith.constant 1.000000e+00 : f32
    %73 = vector.broadcast %cst_54 : f32 to vector<1x324xf32>
    %74 = arith.subf %73, %72 : vector<1x324xf32>
    %c0_55 = arith.constant 0 : index
    %c0_56 = arith.constant 0 : index
    %75 = vector.load %arg3[%c0_55, %c0_56] : memref<1x324xf32, #tpu.memory_space<vmem>>, vector<1x324xf32>
    %cst_57 = arith.constant 5.000000e-01 : f32
    %76 = vector.broadcast %cst_57 : f32 to vector<1x324xf32>
    %77 = arith.cmpf ogt, %75, %76 : vector<1x324xf32>
    %cst_58 = arith.constant 0.000000e+00 : f32
    %78 = vector.broadcast %cst_58 : f32 to vector<9x324xf32>
    %c0_59 = arith.constant 0 : index
    %c0_60 = arith.constant 0 : index
    %c0_61 = arith.constant 0 : index
    %79 = vector.load %arg5[%c0_59, %c0_60, %c0_61] : memref<1x9x324xf32, #tpu.memory_space<vmem>>, vector<1x9x324xf32>
    %80 = vector.shape_cast %79 : vector<1x9x324xf32> to vector<9x324xf32>
    %81 = vector.shape_cast %78 : vector<9x324xf32> to vector<1x9x324xf32>
    tpu.vector_store %arg5[%c0_59, %c0_60, %c0_61], %81 {strides = array<i32>} : memref<1x9x324xf32, #tpu.memory_space<vmem>>, vector<1x9x324xf32>,
    %82 = vector.extract_strided_slice %57 {offsets = [0, 0], sizes = [1, 324], strides = [1, 1]} : vector<8x324xf32> to vector<1x324xf32>
    %83 = arith.mulf %82, %69 : vector<1x324xf32>
    %cst_62 = arith.constant 0.000000e+00 : f32
    %84 = vector.broadcast %cst_62 : f32 to vector<1x324xf32>
    %85 = arith.select %77, %83, %84 : vector<1x324xi1>, vector<1x324xf32>
    %c0_63 = arith.constant 0 : index
    %c0_64 = arith.constant 0 : index
    %c0_65 = arith.constant 0 : index
    %86 = vector.load %arg5[%c0_63, %c0_64, %c0_65] : memref<1x9x324xf32, #tpu.memory_space<vmem>>, vector<1x1x324xf32>
    %87 = vector.shape_cast %86 : vector<1x1x324xf32> to vector<1x324xf32>
    %88 = vector.shape_cast %85 : vector<1x324xf32> to vector<1x1x324xf32>
    tpu.vector_store %arg5[%c0_63, %c0_64, %c0_65], %88 {strides = array<i32>} : memref<1x9x324xf32, #tpu.memory_space<vmem>>, vector<1x1x324xf32>,
    %89 = vector.extract_strided_slice %57 {offsets = [1, 0], sizes = [1, 324], strides = [1, 1]} : vector<8x324xf32> to vector<1x324xf32>
    %90 = arith.mulf %89, %69 : vector<1x324xf32>
    %cst_66 = arith.constant 0.000000e+00 : f32
    %91 = vector.broadcast %cst_66 : f32 to vector<1x324xf32>
    %92 = arith.select %77, %90, %91 : vector<1x324xi1>, vector<1x324xf32>
    %93 = vector.extract_strided_slice %92 {offsets = [0, 0], sizes = [1, 323], strides = [1, 1]} : vector<1x324xf32> to vector<1x323xf32>
    %c0_67 = arith.constant 0 : index
    %c1_68 = arith.constant 1 : index
    %c1_69 = arith.constant 1 : index
    %94 = vector.load %arg5[%c0_67, %c1_68, %c1_69] : memref<1x9x324xf32, #tpu.memory_space<vmem>>, vector<1x1x323xf32>
    %95 = vector.shape_cast %94 : vector<1x1x323xf32> to vector<1x323xf32>
    %96 = vector.shape_cast %93 : vector<1x323xf32> to vector<1x1x323xf32>
    tpu.vector_store %arg5[%c0_67, %c1_68, %c1_69], %96 {strides = array<i32>} : memref<1x9x324xf32, #tpu.memory_space<vmem>>, vector<1x1x323xf32>,
    %97 = vector.extract_strided_slice %57 {offsets = [2, 0], sizes = [1, 324], strides = [1, 1]} : vector<8x324xf32> to vector<1x324xf32>
    %98 = arith.mulf %97, %69 : vector<1x324xf32>
    %cst_70 = arith.constant 0.000000e+00 : f32
    %99 = vector.broadcast %cst_70 : f32 to vector<1x324xf32>
    %100 = arith.select %77, %98, %99 : vector<1x324xi1>, vector<1x324xf32>
    %101 = vector.extract_strided_slice %100 {offsets = [0, 0], sizes = [1, 322], strides = [1, 1]} : vector<1x324xf32> to vector<1x322xf32>
    %c0_71 = arith.constant 0 : index
    %c2_72 = arith.constant 2 : index
    %c2_73 = arith.constant 2 : index
    %102 = vector.load %arg5[%c0_71, %c2_72, %c2_73] : memref<1x9x324xf32, #tpu.memory_space<vmem>>, vector<1x1x322xf32>
    %103 = vector.shape_cast %102 : vector<1x1x322xf32> to vector<1x322xf32>
    %104 = vector.shape_cast %101 : vector<1x322xf32> to vector<1x1x322xf32>
    tpu.vector_store %arg5[%c0_71, %c2_72, %c2_73], %104 {strides = array<i32>} : memref<1x9x324xf32, #tpu.memory_space<vmem>>, vector<1x1x322xf32>,
    %105 = vector.extract_strided_slice %57 {offsets = [3, 0], sizes = [1, 324], strides = [1, 1]} : vector<8x324xf32> to vector<1x324xf32>
    %106 = arith.mulf %105, %69 : vector<1x324xf32>
    %cst_74 = arith.constant 0.000000e+00 : f32
    %107 = vector.broadcast %cst_74 : f32 to vector<1x324xf32>
    %108 = arith.select %77, %106, %107 : vector<1x324xi1>, vector<1x324xf32>
    %109 = vector.extract_strided_slice %108 {offsets = [0, 0], sizes = [1, 306], strides = [1, 1]} : vector<1x324xf32> to vector<1x306xf32>
    %c0_75 = arith.constant 0 : index
    %c3_76 = arith.constant 3 : index
    %c18_77 = arith.constant 18 : index
    %110 = vector.load %arg5[%c0_75, %c3_76, %c18_77] : memref<1x9x324xf32, #tpu.memory_space<vmem>>, vector<1x1x306xf32>
    %111 = vector.shape_cast %110 : vector<1x1x306xf32> to vector<1x306xf32>
    %112 = vector.shape_cast %109 : vector<1x306xf32> to vector<1x1x306xf32>
    tpu.vector_store %arg5[%c0_75, %c3_76, %c18_77], %112 {strides = array<i32>} : memref<1x9x324xf32, #tpu.memory_space<vmem>>, vector<1x1x306xf32>,
    %cst_78 = arith.constant 0.000000e+00 : f32
    %113 = vector.broadcast %cst_78 : f32 to vector<1x324xf32>
    %114 = arith.select %77, %74, %113 : vector<1x324xi1>, vector<1x324xf32>
    %115 = vector.extract_strided_slice %114 {offsets = [0, 0], sizes = [1, 305], strides = [1, 1]} : vector<1x324xf32> to vector<1x305xf32>
    %c0_79 = arith.constant 0 : index
    %c4_80 = arith.constant 4 : index
    %c19_81 = arith.constant 19 : index
    %116 = vector.load %arg5[%c0_79, %c4_80, %c19_81] : memref<1x9x324xf32, #tpu.memory_space<vmem>>, vector<1x1x305xf32>
    %117 = vector.shape_cast %116 : vector<1x1x305xf32> to vector<1x305xf32>
    %118 = vector.shape_cast %115 : vector<1x305xf32> to vector<1x1x305xf32>
    tpu.vector_store %arg5[%c0_79, %c4_80, %c19_81], %118 {strides = array<i32>} : memref<1x9x324xf32, #tpu.memory_space<vmem>>, vector<1x1x305xf32>,
    %119 = vector.extract_strided_slice %57 {offsets = [4, 0], sizes = [1, 324], strides = [1, 1]} : vector<8x324xf32> to vector<1x324xf32>
    %120 = arith.mulf %119, %69 : vector<1x324xf32>
    %cst_82 = arith.constant 0.000000e+00 : f32
    %121 = vector.broadcast %cst_82 : f32 to vector<1x324xf32>
    %122 = arith.select %77, %120, %121 : vector<1x324xi1>, vector<1x324xf32>
    %123 = vector.extract_strided_slice %122 {offsets = [0, 0], sizes = [1, 304], strides = [1, 1]} : vector<1x324xf32> to vector<1x304xf32>
    %c0_83 = arith.constant 0 : index
    %c5_84 = arith.constant 5 : index
    %c20_85 = arith.constant 20 : index
    %124 = vector.load %arg5[%c0_83, %c5_84, %c20_85] : memref<1x9x324xf32, #tpu.memory_space<vmem>>, vector<1x1x304xf32>
    %125 = vector.shape_cast %124 : vector<1x1x304xf32> to vector<1x304xf32>
    %126 = vector.shape_cast %123 : vector<1x304xf32> to vector<1x1x304xf32>
    tpu.vector_store %arg5[%c0_83, %c5_84, %c20_85], %126 {strides = array<i32>} : memref<1x9x324xf32, #tpu.memory_space<vmem>>, vector<1x1x304xf32>,
    %127 = vector.extract_strided_slice %57 {offsets = [5, 0], sizes = [1, 324], strides = [1, 1]} : vector<8x324xf32> to vector<1x324xf32>
    %128 = arith.mulf %127, %69 : vector<1x324xf32>
    %cst_86 = arith.constant 0.000000e+00 : f32
    %129 = vector.broadcast %cst_86 : f32 to vector<1x324xf32>
    %130 = arith.select %77, %128, %129 : vector<1x324xi1>, vector<1x324xf32>
    %131 = vector.extract_strided_slice %130 {offsets = [0, 0], sizes = [1, 288], strides = [1, 1]} : vector<1x324xf32> to vector<1x288xf32>
    %c0_87 = arith.constant 0 : index
    %c6_88 = arith.constant 6 : index
    %c36_89 = arith.constant 36 : index
    %132 = vector.load %arg5[%c0_87, %c6_88, %c36_89] : memref<1x9x324xf32, #tpu.memory_space<vmem>>, vector<1x1x288xf32>
    %133 = vector.shape_cast %132 : vector<1x1x288xf32> to vector<1x288xf32>
    %134 = vector.shape_cast %131 : vector<1x288xf32> to vector<1x1x288xf32>
    tpu.vector_store %arg5[%c0_87, %c6_88, %c36_89], %134 {strides = array<i32>} : memref<1x9x324xf32, #tpu.memory_space<vmem>>, vector<1x1x288xf32>,
    %135 = vector.extract_strided_slice %57 {offsets = [6, 0], sizes = [1, 324], strides = [1, 1]} : vector<8x324xf32> to vector<1x324xf32>
    %136 = arith.mulf %135, %69 : vector<1x324xf32>
    %cst_90 = arith.constant 0.000000e+00 : f32
    %137 = vector.broadcast %cst_90 : f32 to vector<1x324xf32>
    %138 = arith.select %77, %136, %137 : vector<1x324xi1>, vector<1x324xf32>
    %139 = vector.extract_strided_slice %138 {offsets = [0, 0], sizes = [1, 287], strides = [1, 1]} : vector<1x324xf32> to vector<1x287xf32>
    %c0_91 = arith.constant 0 : index
    %c7_92 = arith.constant 7 : index
    %c37_93 = arith.constant 37 : index
    %140 = vector.load %arg5[%c0_91, %c7_92, %c37_93] : memref<1x9x324xf32, #tpu.memory_space<vmem>>, vector<1x1x287xf32>
    %141 = vector.shape_cast %140 : vector<1x1x287xf32> to vector<1x287xf32>
    %142 = vector.shape_cast %139 : vector<1x287xf32> to vector<1x1x287xf32>
    tpu.vector_store %arg5[%c0_91, %c7_92, %c37_93], %142 {strides = array<i32>} : memref<1x9x324xf32, #tpu.memory_space<vmem>>, vector<1x1x287xf32>,
    %143 = vector.extract_strided_slice %57 {offsets = [7, 0], sizes = [1, 324], strides = [1, 1]} : vector<8x324xf32> to vector<1x324xf32>
    %144 = arith.mulf %143, %69 : vector<1x324xf32>
    %cst_94 = arith.constant 0.000000e+00 : f32
    %145 = vector.broadcast %cst_94 : f32 to vector<1x324xf32>
    %146 = arith.select %77, %144, %145 : vector<1x324xi1>, vector<1x324xf32>
    %147 = vector.extract_strided_slice %146 {offsets = [0, 0], sizes = [1, 286], strides = [1, 1]} : vector<1x324xf32> to vector<1x286xf32>
    %c0_95 = arith.constant 0 : index
    %c8_96 = arith.constant 8 : index
    %c38_97 = arith.constant 38 : index
    %148 = vector.load %arg5[%c0_95, %c8_96, %c38_97] : memref<1x9x324xf32, #tpu.memory_space<vmem>>, vector<1x1x286xf32>
    %149 = vector.shape_cast %148 : vector<1x1x286xf32> to vector<1x286xf32>
    %150 = vector.shape_cast %147 : vector<1x286xf32> to vector<1x1x286xf32>
    tpu.vector_store %arg5[%c0_95, %c8_96, %c38_97], %150 {strides = array<i32>} : memref<1x9x324xf32, #tpu.memory_space<vmem>>, vector<1x1x286xf32>,
    return
  }
  func.func @transform_0(%arg0: i32) -> (i32, i32, i32) {
    %c0_i32 = arith.constant 0 : i32
    %c0_i32_0 = arith.constant 0 : i32
    %c0_i32_1 = arith.constant 0 : i32
    %c0_i32_2 = arith.constant 0 : i32
    return %c0_i32, %c0_i32_0, %c0_i32_1 : i32, i32, i32
  }
  func.func @transform_1(%arg0: i32) -> (i32, i32) {
    %c0_i32 = arith.constant 0 : i32
    %c0_i32_0 = arith.constant 0 : i32
    %c0_i32_1 = arith.constant 0 : i32
    return %c0_i32, %c0_i32_0 : i32, i32
  }
  func.func @transform_2(%arg0: i32) -> (i32, i32) {
    %c0_i32 = arith.constant 0 : i32
    %c0_i32_0 = arith.constant 0 : i32
    %c0_i32_1 = arith.constant 0 : i32
    return %c0_i32, %c0_i32_0 : i32, i32
  }
  func.func @transform_3(%arg0: i32) -> (i32, i32, i32) {
    %c0_i32 = arith.constant 0 : i32
    %c0_i32_0 = arith.constant 0 : i32
    %c0_i32_1 = arith.constant 0 : i32
    return %arg0, %c0_i32, %c0_i32_0 : i32, i32, i32
  }
  func.func @transform_4(%arg0: i32) -> (i32, i32, i32) {
    %c0_i32 = arith.constant 0 : i32
    %c0_i32_0 = arith.constant 0 : i32
    %c0_i32_1 = arith.constant 0 : i32
    return %arg0, %c0_i32, %c0_i32_0 : i32, i32, i32
  }
}

</mosaic_0001>

<bundles_post_ra>
// kernel: tpu_custom_call.1
= control target key start
LH: loop header
LB: loop body
LE: loop exit
PB: predicated region body
PF: predicated region fallthrough
CT: control target
= control target key end

     0   :  { %s2285_s15 = smov 0   ;;  %s2569_s0 = inlined_call_operand.vmem [shape: f32[9,8,4], index: 0, kind: input, shape index: {}]   ;;  %s2570_s1 = inlined_call_operand.vmem [shape: f32[8,1], index: 1, kind: input, shape index: {}]   ;;  %s2571_s2 = inlined_call_operand.vmem [shape: f32[1,324], index: 2, kind: input, shape index: {}]   ;;  %s2572_s3 = inlined_call_operand.vmem [shape: f32[2,4,378], index: 3, kind: input, shape index: {}]   ;;  %s2573_s4 = inlined_call_operand.vmem [shape: f32[2,9,324], index: 4, kind: output, shape index: {}]  }
   0x1 LB: > { %s2061_s16 = sadd.s32 4294967295, %s2238_s15   ;;  %p2065_p0 = scmp.ge.s32.totalorder %s2238_s15, 1  ;;  %s2238_s15 = sphi %s2285_s15, %s14_s15  }
   0x2   : > { %p162_p1 = scmp.lt.s32.totalorder %s2238_s15, 3 }
   0x4   : > { %p163_p2 = pnand %p2065_p0, %p162_p1 }
   0x5   : > { %p188_p3 = scmp.lt.s32.totalorder (!%p163_p2), %s2061_s16, 1  ;;  %s2242_s21 = smov (!%p163_p2), 127  }
   0x6   : > { %166 = sbr.rel (%p163_p2) target bundleno = 563 (0x233), region = 36  ;;  %s2243_s22 = smov (!%p163_p2), 126  }
   0x7   : > { %s2244_s23 = smov (!%p163_p2), 110   ;;  %s2245_s24 = smov (!%p163_p2), 109  }
   0x8   : > { %s2246_s25 = smov (!%p163_p2), 108   ;;  %s2247_s26 = smov (!%p163_p2), 92  }
   0x9   : > { %s2249_s27 = smov (!%p163_p2), 91   ;;  %s2250_s28 = smov (!%p163_p2), 90  }
   0xa   : > { %s2252_s30 = smov (!%p163_p2), 20   ;;  %s2253_s5 = smov (!%p163_p2), 1  }
   0xb   : > { %v2240_v0 = vmov 0.0   ;;  %vm2241_vm0 = vmmov 0   ;;  %s2585_s16 = smov (!%p188_p3, %s2061_s16), 1  ;;  %v2248_v10 = vmov 0   ;;  %v1700_v12 = vld [vmem:[%s2570_s1] sm:$0xff]  ;;  %vm219_vm1 = vcmask 1043456  }
   0xc   : > { %2149 = vmatprep.subr.mxu1 %v2240_v0  ;;  %2151 = vmatprep.mubr.msk.f32.mxu1 %vm2241_vm0, %v2240_v0  ;;  %s2194_s17 = smul.u32 12, %s2585_s16  ;;  %v2068_v13 = vld [vmem:[%s2569_s0 + $0x8] sm:$0xff]  ;;  %vm215_vm2 = vcmask 31744   ;;  %v200_v16 = vld [vmem:[%s2569_s0] sm:$0xff]  ;;  %vm212_vm3 = vcmask 1039360   ;;  %v2079_v19 = vld [vmem:[%s2569_s0 + $0x10] sm:$0xff] }
   0xd   : > { %290 = vmatprep.mubr.f32.mxu0 %v2240_v0  ;;  %2224 = vset.pattern.permute.xlu0 %v2248_v10  ;;  %vm530_vm4 = vcmask 1031168   ;;  %v2085_v26 = vld [vmem:[%s2569_s0 + $0x18] sm:$0xff]  ;;  %vm699_vm5 = vcmask 900096   ;;  %vm868_vm6 = vcmask 891904   ;;  %v2091_v35 = vld [vmem:[%s2569_s0 + $0x20] sm:$0xff]  ;;  %vm1037_vm7 = vcmask 883712  }
   0xe   : > { %s2303_s20 = scalar_lea.vmem %s2572_s3, %s2194_s17  ;;  %v2097_v40 = vld [vmem:[%s2569_s0 + $0x28] sm:$0xff]  ;;  %vm1206_vm8 = vcmask 752640   ;;  %v2103_v45 = vld [vmem:[%s2569_s0 + $0x30] sm:$0xff]  ;;  %vm1375_vm9 = vcmask 744448   ;;  %v2109_v50 = vld [vmem:[%s2569_s0 + $0x38] sm:$0xff]  ;;  %vm1544_vm10 = vcmask 736256  }
   0xf   : > { %v199_v1 = vld [vmem:[%s2303_s20 + $0x8] sm:$0xf]  ;;  %v2307_v2 = vld [vmem:[%s2303_s20] sm:$0xff]  ;;  %vm1724_vm11 = vcmask 556032   ;;  %vm1785_vm14 = vcmask 548864   ;;  %s2254_s6 = smov 18  }
  0x10   : > { %210 = vrot.lane.b32.xlu0 %v199_v1, %s2242_s21  ;;  %206 = vrot.lane.b32.xlu1 %v2307_v2, %s2242_s21  ;;  %v518_v3 = vld [vmem:[%s2303_s20 + $0x8] sm:$0xf]  ;;  %v2313_v4 = vcombine.high %v2307_v2, %v2307_v2  ;;  %v2115_v57 = vld [vmem:[%s2569_s0 + $0x40] sm:$0xff]  ;;  %s2255_s7 = smov 36   ;;  %s2256_s8 = smov 37  }
  0x11   : > { %v687_v5 = vld [vmem:[%s2303_s20 + $0x8] sm:$0xf]  ;;  %s2257_s9 = smov 2   ;;  %s2258_s10 = smov 19  }
  0x12   : > { %v856_v6 = vld [vmem:[%s2303_s20 + $0x8] sm:$0xf]  ;;  %s2259_s11 = smov 38  }
  0x13   : > { %v1025_v7 = vld [vmem:[%s2303_s20 + $0x8] sm:$0xf] }
  0x14   : > { %528 = vrot.lane.b32.xlu0 %v518_v3, %s2243_s22  ;;  %524 = vrot.lane.b32.xlu1 %v2307_v2, %s2243_s22  ;;  %v1194_v8 = vld [vmem:[%s2303_s20 + $0x8] sm:$0xf] }
  0x15   : > { %v1363_v9 = vld [vmem:[%s2303_s20 + $0x8] sm:$0xf] }
  0x16   : > { %v1532_v11 = vld [vmem:[%s2303_s20 + $0x8] sm:$0xf] }
  0x18   : > { %526 = vrot.lane.b32.xlu1 %v2313_v4, %s2243_s22  ;;  %208 = vrot.lane.b32.xlu0 %v2313_v4, %s2242_s21 }
  0x1c   : > { %697 = vrot.lane.b32.xlu1 %v687_v5, %s2244_s23  ;;  %695 = vrot.lane.b32.xlu0 %v2313_v4, %s2244_s23 }
  0x20   : > { %864 = vrot.lane.b32.xlu1 %v2313_v4, %s2245_s24  ;;  %693 = vrot.lane.b32.xlu0 %v2307_v2, %s2244_s23 }
  0x24   : > { %862 = vrot.lane.b32.xlu1 %v2307_v2, %s2245_s24  ;;  %866 = vrot.lane.b32.xlu0 %v856_v6, %s2245_s24 }
  0x28   : > { %1035 = vrot.lane.b32.xlu1 %v1025_v7, %s2246_s25  ;;  %1033 = vrot.lane.b32.xlu0 %v2313_v4, %s2246_s25 }
  0x2c   : > { %1202 = vrot.lane.b32.xlu1 %v2313_v4, %s2247_s26  ;;  %1031 = vrot.lane.b32.xlu0 %v2307_v2, %s2246_s25  ;;  %s2195_s25 = smul.u32 48, %s2585_s16 }
  0x30   : > { %1200 = vrot.lane.b32.xlu1 %v2307_v2, %s2247_s26  ;;  %1204 = vrot.lane.b32.xlu0 %v1194_v8, %s2247_s26 }
  0x34   : > { %1373 = vrot.lane.b32.xlu1 %v1363_v9, %s2249_s27  ;;  %1371 = vrot.lane.b32.xlu0 %v2313_v4, %s2249_s27 }
  0x38   : > { %1540 = vrot.lane.b32.xlu1 %v2313_v4, %s2250_s28  ;;  %1369 = vrot.lane.b32.xlu0 %v2307_v2, %s2249_s27 }
  0x3c   : > { %1538 = vrot.lane.b32.xlu1 %v2307_v2, %s2250_s28  ;;  %1542 = vrot.lane.b32.xlu0 %v1532_v11, %s2250_s28  ;;  %s2455_s28 = scalar_lea.vmem %s2573_s4, %s2195_s25 }
  0x3d   : > { %1782 = vst.msk [vmem:[%s2455_s28 + $0x10] sm:$0xff] %vm1724_vm11, %v2240_v0  ;;  %1780 = vst [vmem:[%s2455_s28] sm:$0xff] %v2240_v0 }
  0x3e   : > { %1781 = vst [vmem:[%s2455_s28 + $0x8] sm:$0xff] %v2240_v0  ;;  %1783 = vst [vmem:[%s2455_s28 + $0x18] sm:$0x1] %v2240_v0 }
  0x3f   : > { %1784 = vst [vmem:[%s2455_s28 + $0x20] sm:$0x1] %v2240_v0  ;;  %1786 = vst.msk [vmem:[%s2455_s28 + $0x28] sm:$0x1] %vm1785_vm14, %v2240_v0  ;;  %vm1983_vm14 = vcmask 302080  }
  0x40   : > { %1703 = vperm.xlu0 %2224, %v1700_v12  }
  0x82   : > { %v211_v14 = vpop.permute.xlu0 %210  ;;  %v207_v15 = vpop.permute.xlu1 %206 }
  0x83   : > { %2150 = vmatpush3.msk.msra.mxu1 %vm219_vm1, %v211_v14 }
  0x84   : > { %2152 = vmatmul.mubr.msk.f32.vlgmr.msra.gmra.mxu1 %vm215_vm2, %v2068_v13  ;;  %2154 = vmatprep.subr.mxu1 %v2240_v0 }
  0x85   : > { %2155 = vmatpush3.msk.msra.mxu1 %vm219_vm1, %v199_v1  ;;  %2156 = vmatprep.mubr.msk.f32.mxu1 %vm2241_vm0, %v2240_v0 }
  0x86   : > { %v529_v17 = vpop.permute.xlu0 %528  ;;  %v525_v18 = vpop.permute.xlu1 %524  ;;  %2159 = vmatprep.subr.mxu1 %v2240_v0 }
  0x88   : > { %2157 = vmatmul.mubr.msk.f32.vlgmr.msra.gmra.mxu1 %vm215_vm2, %v200_v16 }
  0x89   : > { %2160 = vmatpush3.msk.msra.mxu1 %vm219_vm1, %v529_v17  ;;  %2161 = vmatprep.mubr.msk.f32.mxu1 %vm2241_vm0, %v2240_v0 }
  0x8a   : > { %v527_v20 = vpop.permute.xlu1 %526  ;;  %v209_v21 = vpop.permute.xlu0 %208  ;;  %2164 = vmatprep.subr.mxu1 %v2240_v0 }
  0x8b   : > { %v214_v22 = vsel %vm212_vm3, %v209_v21, %v211_v14  ;;  %v213_v23 = vsel %vm212_vm3, %v207_v15, %v209_v21  ;;  %v532_v27 = vsel %vm530_vm4, %v527_v20, %v529_v17  ;;  %v531_v28 = vsel %vm530_vm4, %v525_v18, %v527_v20 }
  0x8c   : > { %2069 = vmatprep.subr.msk.mxu0 %vm219_vm1, %v214_v22  ;;  %2162 = vmatmul.mubr.msk.f32.vlgmr.msra.gmra.mxu1 %vm215_vm2, %v2079_v19  ;;  %vm1838_vm3 = vcmask 7168  }
  0x8d   : > { %2070 = vmatpush1.msk.msra.mxu0 %vm219_vm1, %v213_v23  ;;  %2166 = vmatprep.mubr.msk.f32.mxu1 %vm2241_vm0, %v2240_v0 }
  0x8e   : > { %v698_v24 = vpop.permute.xlu1 %697  ;;  %2071 = vmatmul.mubr.msk.f32.vlgmr.msra.gmra.mxu0 %vm215_vm2, %v2068_v13  ;;  %2074 = vmatprep.subr.msk.mxu0 %vm219_vm1, %v2313_v4  ;;  %v696_v25 = vpop.permute.xlu0 %695 }
  0x8f   : > { %2075 = vmatpush1.msk.msra.mxu0 %vm219_vm1, %v2307_v2  ;;  %2165 = vmatpush3.msk.msra.mxu1 %vm219_vm1, %v698_v24  ;;  %v701_v31 = vsel %vm699_vm5, %v696_v25, %v698_v24 }
  0x90   : > { %2080 = vmatprep.subr.msk.mxu0 %vm219_vm1, %v532_v27  ;;  %440 = vmatprep.mubr.f32.mxu0 %v2240_v0 }
  0x91   : > { %2169 = vmatprep.subr.mxu1 %v2240_v0  ;;  %2167 = vmatmul.mubr.msk.f32.vlgmr.msra.gmra.mxu1 %vm215_vm2, %v2085_v26 }
  0x92   : > { %v865_v29 = vpop.permute.xlu1 %864  ;;  %2076 = vmatmul.mubr.msk.f32.vlgmr.msra.gmra.mxu0 %vm215_vm2, %v200_v16  ;;  %v694_v30 = vpop.permute.xlu0 %693  ;;  %2171 = vmatprep.mubr.msk.f32.mxu1 %vm2241_vm0, %v2240_v0 }
  0x93   : > { %2081 = vmatpush1.msk.msra.mxu0 %vm219_vm1, %v531_v28  ;;  %606 = vmatprep.mubr.f32.mxu0 %v2240_v0  ;;  %v700_v32 = vsel %vm699_vm5, %v694_v30, %v696_v25 }
  0x94   : > { %2086 = vmatprep.subr.msk.mxu0 %vm219_vm1, %v701_v31 }
  0x96   : > { %v863_v33 = vpop.permute.xlu1 %862  ;;  %2082 = vmatmul.mubr.msk.f32.vlgmr.msra.gmra.mxu0 %vm215_vm2, %v2079_v19  ;;  %v867_v34 = vpop.permute.xlu0 %866 }
  0x97   : > { %2087 = vmatpush1.msk.msra.mxu0 %vm219_vm1, %v700_v32  ;;  %v870_v36 = vsel %vm868_vm6, %v865_v29, %v867_v34  ;;  %2170 = vmatpush3.msk.msra.mxu1 %vm219_vm1, %v867_v34  ;;  %v869_v37 = vsel %vm868_vm6, %v863_v33, %v865_v29 }
  0x98   : > { %2092 = vmatprep.subr.msk.mxu0 %vm219_vm1, %v870_v36  ;;  %775 = vmatprep.mubr.f32.mxu0 %v2240_v0 }
  0x99   : > { %2174 = vmatprep.subr.mxu1 %v2240_v0  ;;  %2172 = vmatmul.mubr.msk.f32.vlgmr.msra.gmra.mxu1 %vm215_vm2, %v2091_v35 }
  0x9a   : > { %v1036_v38 = vpop.permute.xlu1 %1035  ;;  %2088 = vmatmul.mubr.msk.f32.vlgmr.msra.gmra.mxu0 %vm215_vm2, %v2085_v26  ;;  %v1034_v39 = vpop.permute.xlu0 %1033  ;;  %2176 = vmatprep.mubr.msk.f32.mxu1 %vm2241_vm0, %v2240_v0 }
  0x9b   : > { %2093 = vmatpush1.msk.msra.mxu0 %vm219_vm1, %v869_v37  ;;  %v1039_v41 = vsel %vm1037_vm7, %v1034_v39, %v1036_v38  ;;  %2175 = vmatpush3.msk.msra.mxu1 %vm219_vm1, %v1036_v38 }
  0x9c   : > { %2098 = vmatprep.subr.msk.mxu0 %vm219_vm1, %v1039_v41  ;;  %944 = vmatprep.mubr.f32.mxu0 %v2240_v0 }
  0x9d   : > { %2177 = vmatmul.mubr.msk.f32.vlgmr.msra.gmra.mxu1 %vm215_vm2, %v2097_v40  ;;  %2179 = vmatprep.subr.mxu1 %v2240_v0 }
  0x9e   : > { %v1203_v42 = vpop.permute.xlu1 %1202  ;;  %2094 = vmatmul.mubr.msk.f32.vlgmr.msra.gmra.mxu0 %vm215_vm2, %v2091_v35  ;;  %v1032_v43 = vpop.permute.xlu0 %1031  ;;  %2181 = vmatprep.mubr.msk.f32.mxu1 %vm2241_vm0, %v2240_v0 }
  0x9f   : > { %v1038_v44 = vsel %vm1037_vm7, %v1032_v43, %v1034_v39  ;;  %1113 = vmatprep.mubr.f32.mxu0 %v2240_v0  ;;  %vm1868_vm7 = vcmask 146432  }
  0xa0   : > { %2099 = vmatpush1.msk.msra.mxu0 %vm219_vm1, %v1038_v44 }
  0xa2   : > { %v1201_v46 = vpop.permute.xlu1 %1200  ;;  %2100 = vmatmul.mubr.msk.f32.vlgmr.msra.gmra.mxu0 %vm215_vm2, %v2097_v40  ;;  %v1205_v47 = vpop.permute.xlu0 %1204 }
  0xa3   : > { %v1207_v48 = vsel %vm1206_vm8, %v1201_v46, %v1203_v42  ;;  %v1208_v49 = vsel %vm1206_vm8, %v1203_v42, %v1205_v47  ;;  %2180 = vmatpush3.msk.msra.mxu1 %vm219_vm1, %v1205_v47  ;;  %1282 = vmatprep.mubr.f32.mxu0 %v2240_v0 }
  0xa4   : > { %2104 = vmatprep.subr.msk.mxu0 %vm219_vm1, %v1208_v49  ;;  %2182 = vmatmul.mubr.msk.f32.vlgmr.msra.gmra.mxu1 %vm215_vm2, %v2103_v45 }
  0xa5   : > { %2105 = vmatpush1.msk.msra.mxu0 %vm219_vm1, %v1207_v48  ;;  %2184 = vmatprep.subr.mxu1 %v2240_v0 }
  0xa6   : > { %v1374_v51 = vpop.permute.xlu1 %1373  ;;  %2106 = vmatmul.mubr.msk.f32.vlgmr.msra.gmra.mxu0 %vm215_vm2, %v2103_v45  ;;  %v1372_v52 = vpop.permute.xlu0 %1371  ;;  %2186 = vmatprep.mubr.msk.f32.mxu1 %vm2241_vm0, %v2240_v0 }
  0xa7   : > { %v1377_v53 = vsel %vm1375_vm9, %v1372_v52, %v1374_v51  ;;  %2185 = vmatpush3.msk.msra.mxu1 %vm219_vm1, %v1374_v51  ;;  %1451 = vmatprep.mubr.f32.mxu0 %v2240_v0 }
  0xa8   : > { %2110 = vmatprep.subr.msk.mxu0 %vm219_vm1, %v1377_v53  ;;  %2187 = vmatmul.mubr.msk.f32.vlgmr.msra.gmra.mxu1 %vm215_vm2, %v2109_v50 }
  0xa9   : > { %2189 = vmatprep.subr.mxu1 %v2240_v0  ;;  %2191 = vmatprep.mubr.msk.f32.mxu1 %vm2241_vm0, %v2240_v0 }
  0xaa   : > { %v1541_v54 = vpop.permute.xlu1 %1540  ;;  %v1370_v55 = vpop.permute.xlu0 %1369 }
  0xab   : > { %v1376_v56 = vsel %vm1375_vm9, %v1370_v55, %v1372_v52  ;;  %vm1968_vm9 = vcmask 293888  }
  0xac   : > { %2111 = vmatpush1.msk.msra.mxu0 %vm219_vm1, %v1376_v56 }
  0xad   : > { %2112 = vmatmul.mubr.msk.f32.vlgmr.msra.gmra.mxu0 %vm215_vm2, %v2109_v50 }
  0xae   : > { %v1539_v58 = vpop.permute.xlu1 %1538  ;;  %v1543_v59 = vpop.permute.xlu0 %1542  ;;  %1620 = vmatprep.mubr.f32.mxu0 %v2240_v0 }
  0xaf   : > { %v1545_v60 = vsel %vm1544_vm10, %v1539_v58, %v1541_v54  ;;  %v1546_v61 = vsel %vm1544_vm10, %v1541_v54, %v1543_v59  ;;  %2190 = vmatpush3.msk.msra.mxu1 %vm219_vm1, %v1543_v59 }
  0xb0   : > { %2116 = vmatprep.subr.msk.mxu0 %vm219_vm1, %v1546_v61  ;;  %2192 = vmatmul.mubr.msk.f32.vlgmr.msra.gmra.mxu1 %vm215_vm2, %v2115_v57 }
  0xb1   : > { %2117 = vmatpush1.msk.msra.mxu0 %vm219_vm1, %v1545_v60  ;;  %vm1946_vm1 = vcmask 162816  }
  0xb2   : > { %2118 = vmatmul.mubr.msk.f32.vlgmr.msra.gmra.mxu0 %vm215_vm2, %v2115_v57 }
  0xbb   : > { %v1704_v50 = vpop.permute.xlu0 %1703 }
 0x144   : > { %v363_v62 = vpop.f32.mrf.mxu1 }
 0x146   : > { %v2153_v63 = vpop.f32.mrf.mxu1 }
 0x148   : > { %v513_v1 = vpop.f32.mrf.mxu1 }
 0x149   : > { %v514_v15 = vadd.f32 %v513_v1, %v363_v62 }
 0x14a   : > { %v2158_v2 = vpop.f32.mrf.mxu1 }
 0x14c   : > { %v679_v3 = vpop.f32.mrf.mxu1 }
 0x14d   : > { %v685_v20 = vadd.f32 %v679_v3, %v514_v15 }
 0x14e   : > { %v292_v4 = vpop.f32.mrf.mxu0  ;;  %v2163_v5 = vpop.f32.mrf.mxu1 }
 0x150   : > { %v294_v6 = vpop.f32.mrf.mxu0 }
 0x151   : > { %v848_v7 = vpop.f32.mrf.mxu1 }
 0x152   : > { %v442_v8 = vpop.f32.mrf.mxu0  ;;  %v854_v24 = vadd.f32 %v848_v7, %v685_v20 }
 0x153   : > { %v2168_v9 = vpop.f32.mrf.mxu1  ;;  %v443_v27 = vadd.f32 %v442_v8, %v292_v4 }
 0x154   : > { %v444_v10 = vpop.f32.mrf.mxu0 }
 0x155   : > { %v445_v29 = vadd.f32 %v444_v10, %v294_v6 }
 0x156   : > { %v608_v11 = vpop.f32.mrf.mxu0 }
 0x157   : > { %v683_v30 = vadd.f32 %v608_v11, %v443_v27 }
 0x158   : > { %v610_v12 = vpop.f32.mrf.mxu0 }
 0x159   : > { %v1017_v13 = vpop.f32.mrf.mxu1  ;;  %v684_v34 = vadd.f32 %v610_v12, %v445_v29 }
 0x15a   : > { %v777_v14 = vpop.f32.mrf.mxu0  ;;  %v1023_v31 = vadd.f32 %v1017_v13, %v854_v24 }
 0x15b   : > { %v2173_v16 = vpop.f32.mrf.mxu1  ;;  %v852_v35 = vadd.f32 %v777_v14, %v683_v30 }
 0x15c   : > { %v779_v17 = vpop.f32.mrf.mxu0 }
 0x15d   : > { %v1186_v18 = vpop.f32.mrf.mxu1  ;;  %v853_v37 = vadd.f32 %v779_v17, %v684_v34 }
 0x15e   : > { %v946_v19 = vpop.f32.mrf.mxu0  ;;  %v1192_v39 = vadd.f32 %v1186_v18, %v1023_v31 }
 0x15f   : > { %v2178_v21 = vpop.f32.mrf.mxu1  ;;  %v1021_v38 = vadd.f32 %v946_v19, %v852_v35 }
 0x160   : > { %v948_v22 = vpop.f32.mrf.mxu0 }
 0x161   : > { %v1022_v41 = vadd.f32 %v948_v22, %v853_v37 }
 0x162   : > { %v1115_v23 = vpop.f32.mrf.mxu0 }
 0x163   : > { %v1190_v42 = vadd.f32 %v1115_v23, %v1021_v38 }
 0x164   : > { %v1117_v25 = vpop.f32.mrf.mxu0  ;;  %v1355_v26 = vpop.f32.mrf.mxu1 }
 0x165   : > { %v1361_v43 = vadd.f32 %v1355_v26, %v1192_v39  ;;  %v1191_v45 = vadd.f32 %v1117_v25, %v1022_v41 }
 0x166   : > { %v2183_v28 = vpop.f32.mrf.mxu1  ;;  %v1284_v32 = vpop.f32.mrf.mxu0 }
 0x167   : > { %v1359_v46 = vadd.f32 %v1284_v32, %v1190_v42 }
 0x168   : > { %v1524_v33 = vpop.f32.mrf.mxu1  ;;  %v1286_v40 = vpop.f32.mrf.mxu0 }
 0x169   : > { %v1530_v47 = vadd.f32 %v1524_v33, %v1361_v43  ;;  %v1360_v51 = vadd.f32 %v1286_v40, %v1191_v45 }
 0x16a   : > { %v2188_v36 = vpop.f32.mrf.mxu1 }
 0x16d   : > { %v1453_v44 = vpop.f32.mrf.mxu0 }
 0x16e   : > { %v1528_v52 = vadd.f32 %v1453_v44, %v1359_v46  ;;  %v2251_v46 = vmov 1966171168  }
 0x16f   : > { %v1455_v48 = vpop.f32.mrf.mxu0 }
 0x170   : > { %v1693_v49 = vpop.f32.mrf.mxu1  ;;  %v1529_v56 = vadd.f32 %v1455_v48, %v1360_v51  ;;  %v1797_v48 = vlaneseq }
 0x171   : > { %v1699_v53 = vadd.f32 %v1693_v49, %v1530_v47  ;;  %v1795_v47 = vunpack.c.l.s4 %v2251_v46 }
 0x172   : > { %v1622_v54 = vpop.f32.mrf.mxu0  ;;  %v2193_v55 = vpop.f32.mrf.mxu1  ;;  %vm2492_vm13 = vcmp.lt.s32.totalorder %v1797_v48, 324  ;;  %vm1949_vm15 = vcmp.ge.s32.totalorder %v1797_v48, 20  ;;  %vm1841_vm0 = vcmp.ge.s32.totalorder %v1797_v48, 1  ;;  %vm2517_vm5 = vcmp.ge.s32.totalorder %v1797_v48, 18 }
 0x173   : > { %v1697_v57 = vadd.f32 %v1622_v54, %v1528_v52  ;;  %v2468_v58 = vadd.f32 %v1704_v50, %v1699_v53  ;;  %vm1950_vm2 = vmand %vm1949_vm15, %vm2492_vm13  ;;  %vm2522_vm6 = vcmp.ge.s32.totalorder %v1797_v48, 36 }
 0x174   : > { %v1624_v59 = vpop.f32.mrf.mxu0  ;;  %vm1842_vm4 = vmand %vm1841_vm0, %vm2492_vm13  ;;  %vm1853_vm0 = vcmask 15360  }
 0x175   : > { %v2470_v60 = vadd.f32 %v1704_v50, %v1697_v57  ;;  %v1711_v61 = vand.u32 2147483647, %v2468_v58  ;;  %v1698_v62 = vadd.f32 %v1624_v59, %v1529_v56  ;;  %v1765_v23 = vsel %vm1724_vm11, %v2468_v58, 0.0  ;;  %vm1872_vm8 = vmand %vm2517_vm5, %vm2492_vm13 }
 0x176   : > { %v1766_v26 = vrot.slane %v1765_v23, 4  ;;  %v1796_v59 = vunpack.c.0.s8 %v1795_v47  ;;  %vm1972_vm10 = vmand %vm2522_vm6, %vm2492_vm13  ;;  %vm2001_vm5 = vcmp.ge.s32.totalorder %v1797_v48, 38  ;;  %vm1998_vm6 = vcmask 310272  }
 0x177   : > { %v1709_v63 = vand.u32 2147483647, %v2470_v60  ;;  %v1725_v1 = vsel %vm1724_vm11, %v1711_v61, 0.0  ;;  %v2475_v2 = vadd.f32 %v1704_v50, %v1698_v62  ;;  %v1753_v22 = vrot.slane %v2470_v60, 4 }
 0x178   : > { %v1726_v3 = vrot.slane %v1725_v1, 4  ;;  %v1767_v32 = vadd.f32 %v1766_v26, %v1765_v23  ;;  %v1798_v61 = vshrl.u32 %v1797_v48, 7  ;;  %vm2537_vm11 = vcmp.ge.s32.totalorder %v1797_v48, 37 }
 0x179   : > { %v1712_v4 = vrot.slane %v1709_v63, 4  ;;  %v1710_v5 = vand.u32 2147483647, %v2475_v2  ;;  %v1759_v24 = vrot.slane %v2475_v2, 4  ;;  %v1754_v25 = vadd.f32 %v1753_v22, %v2470_v60  ;;  %vm1987_vm15 = vmand %vm2537_vm11, %vm2492_vm13 }
 0x17a   : > { %v1727_v6 = vadd.f32 %v1726_v3, %v1725_v1  ;;  %v1768_v41 = vrot.slane %v1767_v32, 2 }
 0x17b   : > { %v1713_v7 = vadd.f32 %v1712_v4, %v1709_v63  ;;  %v1718_v8 = vrot.slane %v1710_v5, 4  ;;  %v1760_v27 = vadd.f32 %v1759_v24, %v2475_v2  ;;  %v1755_v31 = vrot.slane %v1754_v25, 2 }
 0x17c   : > { %v1728_v9 = vrot.slane %v1727_v6, 2  ;;  %v1769_v53 = vadd.f32 %v1768_v41, %v1767_v32 }
 0x17d   : > { %v1714_v10 = vrot.slane %v1713_v7, 2  ;;  %v1719_v11 = vadd.f32 %v1718_v8, %v1710_v5  ;;  %v1761_v34 = vrot.slane %v1760_v27, 2  ;;  %v1756_v40 = vadd.f32 %v1755_v31, %v1754_v25 }
 0x17e   : > { %v1729_v12 = vadd.f32 %v1728_v9, %v1727_v6  ;;  %v1770_v1 = vrot.slane %v1769_v53, 1 }
 0x17f   : > { %v1715_v13 = vadd.f32 %v1714_v10, %v1713_v7  ;;  %v1720_v14 = vrot.slane %v1719_v11, 2  ;;  %v1762_v44 = vadd.f32 %v1761_v34, %v1760_v27  ;;  %v1757_v52 = vrot.slane %v1756_v40, 1 }
 0x180   : > { %v1730_v15 = vrot.slane %v1729_v12, 1  ;;  %v1799_v7 = vsub.s32 %v1796_v59, %v1798_v61 }
 0x181   : > { %v1716_v16 = vrot.slane %v1715_v13, 1  ;;  %v1721_v17 = vadd.f32 %v1720_v14, %v1719_v11  ;;  %v1763_v56 = vrot.slane %v1762_v44, 1  ;;  %v1758_v4 = vadd.f32 %v1757_v52, %v1756_v40 }
 0x182   : > { %v1731_v18 = vadd.f32 %v1730_v15, %v1729_v12 }
 0x183   : > { %v1717_v19 = vadd.f32 %v1716_v16, %v1715_v13  ;;  %v1722_v20 = vrot.slane %v1721_v17, 1  ;;  %v1764_v6 = vadd.f32 %v1763_v56, %v1762_v44  ;;  %v1771_v13 = vadd.f32 %v1770_v1, %v1769_v53 }
 0x184   : > { %2226 = vrcp.f32 %v1731_v18 }
 0x185   : > { %2228 = vrcp.f32 %v1717_v19  ;;  %v1723_v21 = vadd.f32 %v1722_v20, %v1721_v17 }
 0x187   : > { %2230 = vrcp.f32 %v1723_v21 }
 0x191   : > { %v2227_v28 = vpop.eup %2226 }
 0x192   : > { %v2229_v29 = vpop.eup %2228  ;;  %v1737_v30 = vmul.f32 %v2227_v28, %v1731_v18 }
 0x193   : > { %v1735_v33 = vmul.f32 %v2229_v29, %v1717_v19 }
 0x194   : > { %v2231_v35 = vpop.eup %2230  ;;  %v1740_v36 = vsub.f32 2.0, %v1737_v30 }
 0x195   : > { %v1738_v37 = vsub.f32 2.0, %v1735_v33  ;;  %v1736_v38 = vmul.f32 %v2231_v35, %v1723_v21 }
 0x196   : > { %v1743_v39 = vmul.f32 %v2227_v28, %v1740_v36 }
 0x197   : > { %v1741_v42 = vmul.f32 %v2229_v29, %v1738_v37  ;;  %v1739_v43 = vsub.f32 2.0, %v1736_v38 }
 0x198   : > { %v1746_v45 = vmul.f32 %v1743_v39, %v1731_v18 }
 0x199   : > { %v1744_v49 = vmul.f32 %v1741_v42, %v1717_v19  ;;  %v1742_v50 = vmul.f32 %v2231_v35, %v1739_v43 }
 0x19a   : > { %v1749_v51 = vsub.f32 2.0, %v1746_v45 }
 0x19b   : > { %v1747_v54 = vsub.f32 2.0, %v1744_v49  ;;  %v1745_v55 = vmul.f32 %v1742_v50, %v1723_v21 }
 0x19c   : > { %v1752_v57 = vmul.f32 %v1749_v51, %v1743_v39 }
 0x19d   : > { %v1750_v62 = vmul.f32 %v1747_v54, %v1741_v42  ;;  %v1748_v63 = vsub.f32 2.0, %v1745_v55 }
 0x19e   : > { %v1789_v3 = vmul.f32 %v1752_v57, %v2468_v58  ;;  %v1774_v17 = vmul.f32 %v1771_v13, %v1752_v57  ;;  %v1778_v58 = vld [vmem:[%s2571_s2] sm:$0x7] }
 0x19f   : > { %v1751_v5 = vmul.f32 %v1748_v63, %v1742_v50  ;;  %v1772_v8 = vmul.f32 %v1758_v4, %v1750_v62  ;;  %v1787_v9 = vmul.f32 %v1750_v62, %v2470_v60  ;;  %vm1779_vm12 = vcmp.gt.f32.partialorder %v1778_v58, 0.5 }
 0x1a0   : > { %v1917_v11 = vcombine.high %v1789_v3, %v1789_v3  ;;  %v1807_v22 = vrot.slane %v1789_v3, %v1799_v7  ;;  %v1777_v26 = vsub.f32 1.0, %v1774_v17 }
 0x1a1   : > { %v1788_v10 = vmul.f32 %v1751_v5, %v2475_v2  ;;  %v1773_v12 = vmul.f32 %v1764_v6, %v1751_v5  ;;  %v1775_v18 = vsub.f32 1.0, %v1772_v8 }
 0x1a2   : > { %v1931_v20 = vrot.slane %v1917_v11, %v1799_v7  ;;  %v1893_v37 = vrot.slane %v1777_v26, %v1799_v7 }
 0x1a3   : > { %v1916_v14 = vcombine.high %v1787_v9, %v1788_v10  ;;  %v1793_v15 = vcombine.low %v1787_v9, %v1788_v10  ;;  %v1776_v16 = vsub.f32 1.0, %v1773_v12 }
 0x1a5   : > { %v1924_v19 = vrot.slane %v1916_v14, %v1799_v7  ;;  %v1800_v21 = vrot.slane %v1793_v15, %v1799_v7  ;;  %v1879_v23 = vcombine.low %v1775_v18, %v1776_v16 }
 0x1a7   : > { %v1932_v60 = vcombine.low %v1924_v19, %v1931_v20  ;;  %v1824_v24 = vcombine.high %v1800_v21, %v1807_v22  ;;  %v1954_v2 = vcombine.high %v1924_v19, %v1931_v20  ;;  %v1808_v25 = vcombine.low %v1800_v21, %v1807_v22 }
 0x1a8   : > { %v1886_v31 = vrot.slane %v1879_v23, %v1799_v7 }
 0x1a9   : > { %v1939_v27 = vrot.slane %v1932_v60, %v1799_v7  ;;  %v1831_v28 = vrot.slane %v1824_v24, %v1799_v7  ;;  %v1815_v29 = vrot.slane %v1808_v25, %v1799_v7  ;;  %v1961_v35 = vrot.slane %v1954_v2, %v1799_v7 }
 0x1aa   : > { %v1894_v38 = vcombine.low %v1886_v31, %v1893_v37 }
 0x1ab   : > { %v1941_v32 = vsel %vm1779_vm12, %v1939_v27, 0.0  ;;  %v1833_v33 = vsel %vm1779_vm12, %v1831_v28, 0.0  ;;  %v1861_v34 = vcombine.high %v1831_v28, %v1831_v28  ;;  %v1817_v36 = vsel %vm1779_vm12, %v1815_v29, 0.0 }
 0x1ac   : > { %1943 = vrot.lane.b32.xlu0 %v1941_v32, %s2252_s30  ;;  %1835 = vrot.lane.b32.xlu1 %v1833_v33, %s2253_s5  ;;  %1822 = vst.msk [vmem:[%s2455_s28] ss:$8 sm:$0x7] %vm2492_vm13, %v1817_v36  ;;  %v1963_v40 = vsel %vm1779_vm12, %v1961_v35, 0.0  ;;  %v1976_v41 = vcombine.high %v1939_v27, %v1939_v27  ;;  %v1846_v42 = vcombine.high %v1815_v29, %v1815_v29 }
 0x1ad   : > { %v1863_v39 = vsel %vm1779_vm12, %v1861_v34, 0.0  ;;  %v1901_v45 = vrot.slane %v1894_v38, %v1799_v7  ;;  %v1991_v47 = vcombine.high %v1961_v35, %v1961_v35 }
 0x1ae   : > { %v1978_v43 = vsel %vm1779_vm12, %v1976_v41, 0.0  ;;  %v1848_v44 = vsel %vm1779_vm12, %v1846_v42, 0.0 }
 0x1af   : > { %v1903_v46 = vsel %vm1779_vm12, %v1901_v45, 0.0  ;;  %v1993_v0 = vsel %vm1779_vm12, %v1991_v47, 0.0  ;;  %vm2542_vm12 = vcmp.ge.s32.totalorder %v1797_v48, 2 }
 0x1b0   : > { %1865 = vrot.lane.b32.xlu0 %v1863_v39, %s2254_s6  ;;  %1965 = vrot.lane.b32.xlu1 %v1963_v40, %s2255_s7 }
 0x1b4   : > { %1980 = vrot.lane.b32.xlu0 %v1978_v43, %s2256_s8  ;;  %1850 = vrot.lane.b32.xlu1 %v1848_v44, %s2257_s9 }
 0x1b8   : > { %1905 = vrot.lane.b32.xlu1 %v1903_v46, %s2258_s10 }
 0x1bc   : > { %1995 = vrot.lane.b32.xlu1 %v1993_v0, %s2259_s11 }
 0x21e   : > { %v1944_v49 = vpop.permute.xlu0 %1943  ;;  %v1836_v50 = vpop.permute.xlu1 %1835 }
 0x21f   : > { %v1945_v51 = vrot.slane %v1944_v49, 7  ;;  %v1837_v52 = vrot.slane %v1836_v50, 7 }
 0x221   : > { %v1947_v55 = vsel %vm1946_vm1, %v1945_v51, %v1944_v49  ;;  %v1839_v56 = vsel %vm1838_vm3, %v1837_v52, %v1836_v50  ;;  %vm1857_vm1 = vmand %vm2542_vm12, %vm2492_vm13  ;;  %vm1908_vm3 = vcmask 154624  }
 0x222   : > { %2125 = vst.msk [vmem:[%s2455_s28 + $0x5] ss:$8 sm:$0x7] %vm1950_vm2, %v1947_v55  ;;  %v1866_v57 = vpop.permute.xlu0 %1865  ;;  %v1966_v59 = vpop.permute.xlu1 %1965  ;;  %vm1911_vm2 = vcmp.ge.s32.totalorder %v1797_v48, 19 }
 0x223   : > { %2121 = vst.msk [vmem:[%s2455_s28 + $0x1] ss:$8 sm:$0x7] %vm1842_vm4, %v1839_v56  ;;  %v1867_v61 = vrot.slane %v1866_v57, 7  ;;  %v1967_v62 = vrot.slane %v1966_v59, 7  ;;  %vm1912_vm4 = vmand %vm1911_vm2, %vm2492_vm13 }
 0x225   : > { %v1869_v3 = vsel %vm1868_vm7, %v1867_v61, %v1866_v57  ;;  %v1969_v4 = vsel %vm1968_vm9, %v1967_v62, %v1966_v59  ;;  %vm2002_vm7 = vmand %vm2001_vm5, %vm2492_vm13 }
 0x226   : > { %2123 = vst.msk [vmem:[%s2455_s28 + $0x3] ss:$8 sm:$0x7] %vm1872_vm8, %v1869_v3  ;;  %v1981_v5 = vpop.permute.xlu0 %1980  ;;  %v1851_v6 = vpop.permute.xlu1 %1850 }
 0x227   : > { %2126 = vst.msk [vmem:[%s2455_s28 + $0x6] ss:$8 sm:$0x7] %vm1972_vm10, %v1969_v4  ;;  %v1982_v7 = vrot.slane %v1981_v5, 7  ;;  %v1852_v8 = vrot.slane %v1851_v6, 7 }
 0x229   : > { %v1984_v9 = vsel %vm1983_vm14, %v1982_v7, %v1981_v5  ;;  %v1854_v10 = vsel %vm1853_vm0, %v1852_v8, %v1851_v6 }
 0x22a   : > { %2127 = vst.msk [vmem:[%s2455_s28 + $0x7] ss:$8 sm:$0x7] %vm1987_vm15, %v1984_v9  ;;  %v1906_v11 = vpop.permute.xlu1 %1905 }
 0x22b   : > { %2122 = vst.msk [vmem:[%s2455_s28 + $0x2] ss:$8 sm:$0x7] %vm1857_vm1, %v1854_v10  ;;  %v1907_v12 = vrot.slane %v1906_v11, 7 }
 0x22d   : > { %v1909_v13 = vsel %vm1908_vm3, %v1907_v12, %v1906_v11 }
 0x22e   : > { %2124 = vst.msk [vmem:[%s2455_s28 + $0x4] ss:$8 sm:$0x7] %vm1912_vm4, %v1909_v13  ;;  %v1996_v14 = vpop.permute.xlu1 %1995 }
 0x22f   : > { %v1997_v15 = vrot.slane %v1996_v14, 7 }
 0x231   : > { %v1999_v16 = vsel %vm1998_vm6, %v1997_v15, %v1996_v14 }
 0x232   : > { %2128 = vst.msk [vmem:[%s2455_s28 + $0x18] ss:$8 sm:$0x7] %vm2002_vm7, %v1999_v16 }
 0x233 PF: > { %s14_s15 = sadd.s32 1, %s2238_s15  }
 0x234   : > { %p11_p4 = scmp.ge.s32.totalorder %s14_s15, 4  }
 0x236   :  { %13 = sbr.rel (!%p11_p4) target bundleno = 1 (0x1), region = 82 }

</bundles_post_ra>
